<compile_context>
chip_gen: v6e
topology: v6e:2x2x1
jax: 0.10.0
libtpu: 0.0.40
codegen_flags: <defaults>
</compile_context>

<pallas_src>
import math
import functools

import jax
import jax.numpy as jnp
from jax.experimental import pallas as pl
from jax.experimental.pallas import tpu as pltpu


def _round_up(v, m):
    return (v + m - 1) // m * m


def _equal_linear_kernel(x_ref, w_ref, b_ref, o_ref, *, scale, lr_mul, activation):
    # x_ref: (tm, K)   w_ref: (tn, K)   b_ref: (1, tn)   o_ref: (tm, tn)
    # F.linear(x, W) == x @ W.T : contract dim 1 of x with dim 1 of w (no transpose copy).
    y = jax.lax.dot_general(
        x_ref[...], w_ref[...],
        dimension_numbers=(((1,), (1,)), ((), ())),
        preferred_element_type=jnp.float32,
    )
    # Fold the equalized-lr scale into the (tm, tn) output, not the weight tile.
    b = b_ref[...].astype(jnp.float32) * lr_mul  # (1, tn), broadcasts over rows
    y = y * scale + b
    if activation:
        # fused_leaky_relu: leaky_relu(y + b, 0.2) * sqrt(2)
        y = jnp.where(y >= 0.0, y, 0.2 * y) * math.sqrt(2.0)
    o_ref[...] = y.astype(o_ref.dtype)


def equal_linear(x, weight, bias=None, *, lr_mul=1.0, activation=None):
    """Pallas implementation of EqualLinear.forward.

    x:      (B, in_dim)
    weight: (out_dim, in_dim)   (PyTorch nn.Linear layout)
    bias:   (out_dim,) or None
    """
    B, in_dim = x.shape
    out_dim = weight.shape[0]
    assert weight.shape[1] == in_dim
    scale = 1.0 / math.sqrt(in_dim) * lr_mul

    dtype = x.dtype
    dsize = jnp.dtype(dtype).itemsize
    sub = 16 if dtype == jnp.bfloat16 else 8  # sublane packing granularity

    if bias is None:
        bias = jnp.zeros((out_dim,), dtype=jnp.float32)
    if weight.dtype != dtype:
        weight = weight.astype(dtype)  # weight is small; MXU wants matching operand dtypes

    # K: the contraction axis must be real zeros if padded; pad only when needed.
    K_p = _round_up(in_dim, 128)
    if K_p != in_dim:
        x = jnp.pad(x, ((0, 0), (0, K_p - in_dim)))
        weight = jnp.pad(weight, ((0, 0), (0, K_p - in_dim)))
    b2 = bias.reshape(1, out_dim)

    kernel = functools.partial(
        _equal_linear_kernel, scale=scale, lr_mul=lr_mul, activation=bool(activation))

    # Conservative VMEM budget that fits every generation's scoped default
    # (v5e 16 MiB, v6e/v7x 32 MiB), leaving double-buffering headroom.
    VMEM_BUDGET = 12 * 1024 * 1024
    w_bytes = 2 * (out_dim * K_p + out_dim) * dsize          # resident W + bias (x2 buffers)
    per_row = 2 * (K_p + out_dim) * dsize + out_dim * 4      # x row + out row (x2) + f32 temp

    if w_bytes + per_row * sub <= VMEM_BUDGET:
        # ---- primary path: weight fully VMEM-resident, 1-D grid over M ----------
        tm_cap = max(sub, ((VMEM_BUDGET - w_bytes) // per_row // sub) * sub)
        TM_MAX = 512
        if B > TM_MAX:
            tm = TM_MAX
        elif B >= 256:
            # Split M two ways so both v7x TensorCores get a slice of the grid.
            tm = _round_up((B + 1) // 2, sub)
        else:
            tm = B  # single step; block dim == full array dim is always legal
        tm = min(tm, tm_cap)

        grid = (pl.cdiv(B, tm),)
        in_specs = [
            pl.BlockSpec((tm, K_p), lambda m: (m, 0)),
            pl.BlockSpec((out_dim, K_p), lambda m: (0, 0)),   # constant block: DMA'd once
            pl.BlockSpec((1, out_dim), lambda m: (0, 0)),
        ]
        out_specs = pl.BlockSpec((tm, out_dim), lambda m: (m, 0))
        dim_sem = ("parallel",)
    else:
        # ---- fallback: weight too large to hold resident; tile N as well --------
        # Larger operand (W) indexed by the OUTER axis -> each W block DMA'd once;
        # x re-streams on the inner loop.
        # TODO(synk): add a K grid axis + f32 accumulator if in_dim also grows huge.
        tn = 256
        tm = 256 if B >= 256 else B
        grid = (pl.cdiv(out_dim, tn), pl.cdiv(B, tm))
        in_specs = [
            pl.BlockSpec((tm, K_p), lambda n, m: (m, 0)),
            pl.BlockSpec((tn, K_p), lambda n, m: (n, 0)),
            pl.BlockSpec((1, tn), lambda n, m: (0, n)),
        ]
        out_specs = pl.BlockSpec((tm, tn), lambda n, m: (m, n))
        dim_sem = ("parallel", "parallel")

    out = pl.pallas_call(
        kernel,
        out_shape=jax.ShapeDtypeStruct((B, out_dim), dtype),
        grid_spec=pltpu.PrefetchScalarGridSpec(
            num_scalar_prefetch=0,
            grid=grid,
            in_specs=in_specs,
            out_specs=out_specs,
        ),
        compiler_params=pltpu.CompilerParams(
            dimension_semantics=dim_sem,
            vmem_limit_bytes=32 * 1024 * 1024,
        ),
    )(x, weight, b2)
    return out


def equal_linear_ref(x, weight, bias, *, lr_mul=1.0, activation=None):
    """Pure-JAX reference mirroring the PyTorch forward (f32)."""
    x = x.astype(jnp.float32)
    weight = weight.astype(jnp.float32)
    bias = bias.astype(jnp.float32)
    scale = 1.0 / math.sqrt(x.shape[-1]) * lr_mul
    y = x @ (weight * scale).T
    y = y + (bias * lr_mul)[None, :]
    if activation:
        y = jnp.where(y >= 0.0, y, 0.2 * y) * math.sqrt(2.0)
    return y


if __name__ == "__main__":
    key = jax.random.PRNGKey(0)
    k_x1, k_w1, k_x2, k_w2 = jax.random.split(key, 4)

    # ---- case 1: f32, tiny style-MLP-like shapes, lr_mul != 1, both branches ----
    B, in_dim, out_dim = 8, 32, 64
    lr_mul, bias_init = 0.01, 1.0
    x = jax.random.normal(k_x1, (B, in_dim), dtype=jnp.float32)
    weight = jax.random.normal(k_w1, (out_dim, in_dim), dtype=jnp.float32) / lr_mul
    bias = jnp.full((out_dim,), bias_init, dtype=jnp.float32)

    y_plain = jax.block_until_ready(
        equal_linear(x, weight, bias, lr_mul=lr_mul, activation=None))
    y_act = jax.block_until_ready(
        equal_linear(x, weight, bias, lr_mul=lr_mul, activation="fused_lrelu"))
    ref_plain = equal_linear_ref(x, weight, bias, lr_mul=lr_mul, activation=None)
    ref_act = equal_linear_ref(x, weight, bias, lr_mul=lr_mul, activation="fused_lrelu")

    assert y_plain.shape == (B, out_dim) and y_act.shape == (B, out_dim)
    assert jnp.allclose(y_plain, ref_plain, atol=1e-5, rtol=1e-5)
    assert jnp.allclose(y_act, ref_act, atol=1e-5, rtol=1e-5)

    # ---- case 2: bf16 operands, multi-step grid with a partial M edge block -----
    B2, in2, out2 = 300, 128, 128
    x2 = jax.random.normal(k_x2, (B2, in2), dtype=jnp.float32).astype(jnp.bfloat16)
    w2 = jax.random.normal(k_w2, (out2, in2), dtype=jnp.float32).astype(jnp.bfloat16)
    b2 = jnp.zeros((out2,), dtype=jnp.float32)

    y2 = jax.block_until_ready(
        equal_linear(x2, w2, b2, lr_mul=1.0, activation="fused_lrelu"))
    ref2 = equal_linear_ref(x2, w2, b2, lr_mul=1.0, activation="fused_lrelu")

    assert y2.shape == (B2, out2) and y2.dtype == jnp.bfloat16
    assert jnp.allclose(y2.astype(jnp.float32), ref2, atol=2e-2, rtol=2e-2)

    print("KERNEL_OK")
</pallas_src>

<mosaic_0001>
module attributes {stable_mosaic.version = 11 : i64} {
  func.func @_equal_linear_kernel(%arg0: i32, %arg1: memref<8x128xf32, #tpu.memory_space<vmem>>, %arg2: memref<64x128xf32, #tpu.memory_space<vmem>>, %arg3: memref<1x64xf32, #tpu.memory_space<vmem>>, %arg4: memref<8x64xf32, #tpu.memory_space<vmem>>) attributes {dimension_semantics = [#tpu.dimension_semantics<parallel>], iteration_bounds = array<i64: 1>, scalar_prefetch = 0 : i64, scratch_operands = 0 : i64, tpu.core_type = #tpu.core_type<tc>, window_params = [{transform_indices = @transform_0, window_bounds = array<i64: 8, 128>}, {pipeline_mode = #tpu.pipeline_mode<synchronous>, transform_indices = @transform_1, window_bounds = array<i64: 64, 128>}, {pipeline_mode = #tpu.pipeline_mode<synchronous>, transform_indices = @transform_2, window_bounds = array<i64: 1, 64>}, {transform_indices = @transform_3, window_bounds = array<i64: 8, 64>}]} {
    %c0 = arith.constant 0 : index
    %c0_0 = arith.constant 0 : index
    %0 = vector.load %arg1[%c0, %c0_0] : memref<8x128xf32, #tpu.memory_space<vmem>>, vector<8x128xf32>
    %c0_1 = arith.constant 0 : index
    %c0_2 = arith.constant 0 : index
    %1 = vector.load %arg2[%c0_1, %c0_2] : memref<64x128xf32, #tpu.memory_space<vmem>>, vector<64x128xf32>
    %cst = arith.constant dense<0.000000e+00> : vector<8x64xf32>
    %2 = tpu.matmul %0, %1, %cst {dimension_numbers = #tpu.dot_dimension_numbers<[1], [1], [0], [0], [0, 0, 1, 0], [], []>} : vector<8x128xf32>, vector<64x128xf32>, vector<8x64xf32> -> vector<8x64xf32>
    %c0_3 = arith.constant 0 : index
    %c0_4 = arith.constant 0 : index
    %3 = vector.load %arg3[%c0_3, %c0_4] : memref<1x64xf32, #tpu.memory_space<vmem>>, vector<1x64xf32>
    %cst_5 = arith.constant 0.00999999977 : f32
    %4 = vector.broadcast %cst_5 : f32 to vector<1x64xf32>
    %5 = arith.mulf %3, %4 : vector<1x64xf32>
    %cst_6 = arith.constant 0.00176776689 : f32
    %6 = vector.broadcast %cst_6 : f32 to vector<8x64xf32>
    %7 = arith.mulf %2, %6 : vector<8x64xf32>
    %8 = vector.broadcast %5 : vector<1x64xf32> to vector<8x64xf32>
    %9 = arith.addf %7, %8 : vector<8x64xf32>
    %c0_7 = arith.constant 0 : index
    %c0_8 = arith.constant 0 : index
    %10 = vector.load %arg4[%c0_7, %c0_8] : memref<8x64xf32, #tpu.memory_space<vmem>>, vector<8x64xf32>
    tpu.vector_store %arg4[%c0_7, %c0_8], %9 {strides = array<i32>} : memref<8x64xf32, #tpu.memory_space<vmem>>, vector<8x64xf32>,
    return
  }
  func.func @transform_0(%arg0: i32) -> (i32, i32) {
    %c0_i32 = arith.constant 0 : i32
    %c0_i32_0 = arith.constant 0 : i32
    return %arg0, %c0_i32 : i32, i32
  }
  func.func @transform_1(%arg0: i32) -> (i32, i32) {
    %c0_i32 = arith.constant 0 : i32
    %c0_i32_0 = arith.constant 0 : i32
    %c0_i32_1 = arith.constant 0 : i32
    return %c0_i32, %c0_i32_0 : i32, i32
  }
  func.func @transform_2(%arg0: i32) -> (i32, i32) {
    %c0_i32 = arith.constant 0 : i32
    %c0_i32_0 = arith.constant 0 : i32
    %c0_i32_1 = arith.constant 0 : i32
    return %c0_i32, %c0_i32_0 : i32, i32
  }
  func.func @transform_3(%arg0: i32) -> (i32, i32) {
    %c0_i32 = arith.constant 0 : i32
    %c0_i32_0 = arith.constant 0 : i32
    return %arg0, %c0_i32 : i32, i32
  }
}

</mosaic_0001>

<bundles_post_ra>
// kernel: tpu_custom_call.1
= control target key start
LH: loop header
LB: loop body
LE: loop exit
PB: predicated region body
PF: predicated region fallthrough
CT: control target
= control target key end

     0   :  { %8 = vsyncpa [#allocation3], 0  ;;  %s288_s0 = inlined_call_operand.hbm [shape: f32[8,128], index: 0, kind: input, shape index: {}]   ;;  %s289_s1 = inlined_call_operand.hbm [shape: f32[64,128], index: 1, kind: input, shape index: {}]   ;;  %s290_s2 = inlined_call_operand.vmem [shape: f32[1,64], index: 2, kind: input, shape index: {}]   ;;  %s291_s3 = inlined_call_operand.hbm [shape: f32[8,64], index: 3, kind: output, shape index: {}]  }
   0x1   :  { %9 = vsyncpa [#allocation6], 0 }
   0x2   :  { %10 = vsyncpa [#allocation4], 0  ;;  %s249_s12 = smov [#allocation2]   ;;  %s250_s14 = smov [#allocation5]  }
   0x3   :  { %s17_s13 = sshll.u32 %s249_s12, 4  ;;  %s26_s15 = sshll.u32 %s250_s14, 4  ;;  %s18_s13 = int_to_ptr.vmem [resolvable:$true] %s17_s13  ;;  %s27_s15 = int_to_ptr.vmem [resolvable:$true] %s26_s15 }
   0x4   :  { %s191_s16 = scalar_lea.vmem %s18_s13, 128  ;;  %p196_p1 = scmp.lt.s32.totalorder %s18_s13, %s18_s13 }
   0x5   :  { %p192_p0 = scmp.ne.s32.totalorder %s18_s13, %s191_s16  ;;  %p197_p2 = scmp.lt.s32.totalorder %s191_s16, %s191_s16 }
   0x7   :  { %p198_p3 = por %p197_p2, %p196_p1 }
   0x9   :  { %p199_p4 = pnand %p198_p3, %p192_p0 }
   0xb   :  { %202 = shalt.err (!%p199_p4)
}
   0xc   :  { %20 = dma.hbm_to_vmem [thread:$0]  %s288_s0, 128, %s18_s13, [#allocation3]  }
   0xd   :  { %s211_s19 = scalar_lea.vmem %s27_s15, 1024  ;;  %p216_p6 = scmp.lt.s32.totalorder %s27_s15, %s27_s15 }
   0xe   :  { %p212_p5 = scmp.ne.s32.totalorder %s27_s15, %s211_s19  ;;  %p217_p7 = scmp.lt.s32.totalorder %s211_s19, %s211_s19 }
  0x10   :  { %p218_p8 = por %p217_p7, %p216_p6 }
  0x12   :  { %p219_p9 = pnand %p218_p8, %p212_p5 }
  0x14   :  { %222 = shalt.err (!%p219_p9)
}
  0x15   :  { %s251_s20 = smov 128   ;;  %s252_s21 = smov 8  }
  0x16   :  { %32 = dma.hbm_to_vmem [thread:$0]  %s289_s1, 1024, %s27_s15, [#allocation6], %s251_s20, %s251_s20, %s252_s21  }
  0x17   :  { %243 = dma.done.wait [#allocation3], 128  }
  0x18   :  { %244 = vsyncadd [#allocation3], 4294967168 }
  0x19   :  { %245 = dma.done.wait [#allocation6], 1024  }
  0x1a   :  { %246 = vsyncadd [#allocation6], 4294966272  ;;  %v253_v0 = vmov 0.0   ;;  %vm254_vm0 = vmmov 0   ;;  %v49_v1 = vld [vmem:[#allocation5 + $0x38] sm:$0xff]  ;;  %v48_v2 = vld [vmem:[#allocation5 + $0x30] sm:$0xff]  ;;  %v124_v10 = vlaneseq }
  0x1b   :  { %157 = vmatprep.subr.mxu0 %v253_v0  ;;  %173 = vmatprep.mubr.msk.f32.mxu0 %vm254_vm0, %v253_v0  ;;  %v47_v3 = vld [vmem:[#allocation5 + $0x28] sm:$0xff]  ;;  %v46_v4 = vld [vmem:[#allocation5 + $0x20] sm:$0xff]  ;;  %v45_v5 = vld [vmem:[#allocation5 + $0x18] sm:$0xff]  ;;  %s255_s24 = smov [#allocation7]   ;;  %vm130_vm1 = vcmask 523264  }
  0x1c   :  { %158 = vmatpush3.xpose.msra.mxu0 %v49_v1  ;;  %v44_v6 = vld [vmem:[#allocation5 + $0x10] sm:$0xff]  ;;  %v43_v7 = vld [vmem:[#allocation5 + $0x8] sm:$0xff]  ;;  %v42_v8 = vld [vmem:[#allocation5] sm:$0xff]  ;;  %v125_v11 = vshrl.u32 %v124_v10, 7  ;;  %s138_s25 = sshll.u32 %s255_s24, 4  ;;  %s139_s25 = int_to_ptr.vmem [resolvable:$true] %s138_s25 }
  0x1d   :  { %159 = vmatprep.subr.mxu0 %v253_v0  ;;  %v41_v9 = vld [vmem:[#allocation2] sm:$0xff]  ;;  %s223_s26 = scalar_lea.vmem %s139_s25, 128  ;;  %p228_p11 = scmp.lt.s32.totalorder %s139_s25, %s139_s25 }
  0x1e   :  { %v120_v12 = vld [vmem:[%s290_s2] sm:$0x1]  ;;  %v126_v14 = vsub.s32 0, %v125_v11  ;;  %p224_p10 = scmp.ne.s32.totalorder %s139_s25, %s223_s26  ;;  %p229_p12 = scmp.lt.s32.totalorder %s223_s26, %s223_s26 }
  0x1f   :  { %v121_v13 = vmul.f32 0.01, %v120_v12 }
  0x20   :  { %160 = vmatpush3.xpose.msra.mxu0 %v48_v2  ;;  %p230_p13 = por %p229_p12, %p228_p11 }
  0x21   :  { %161 = vmatprep.subr.mxu0 %v253_v0  ;;  %v127_v15 = vrot.slane %v121_v13, %v126_v14 }
  0x22   :  { %p231_p0 = pnand %p230_p13, %p224_p10 }
  0x24   :  { %162 = vmatpush3.xpose.msra.mxu0 %v47_v3 }
  0x25   :  { %163 = vmatprep.subr.mxu0 %v253_v0 }
  0x28   :  { %164 = vmatpush3.xpose.msra.mxu0 %v46_v4 }
  0x29   :  { %165 = vmatprep.subr.mxu0 %v253_v0 }
  0x2c   :  { %166 = vmatpush3.xpose.msra.mxu0 %v45_v5 }
  0x2d   :  { %167 = vmatprep.subr.mxu0 %v253_v0 }
  0x30   :  { %168 = vmatpush3.xpose.msra.mxu0 %v44_v6 }
  0x31   :  { %169 = vmatprep.subr.mxu0 %v253_v0 }
  0x34   :  { %170 = vmatpush3.xpose.msra.mxu0 %v43_v7 }
  0x35   :  { %171 = vmatprep.subr.mxu0 %v253_v0 }
  0x38   :  { %172 = vmatpush3.xpose.msra.mxu0 %v42_v8 }
  0x3b   :  { %174 = vmatmul.mubr.f32.vlgmr.msra.gmra.mxu0 %v41_v9 }
  0xfb   :  { %v116_v16 = vpop.f32.mrf.mxu0 }
  0xfc   :  { %v122_v17 = vmul.f32 0.0017677669, %v116_v16 }
  0xfd   :  { %v175_v18 = vpop.f32.mrf.mxu0 }
  0xfe   :  { %v129_v19 = vadd.f32 %v127_v15, %v122_v17 }
 0x100   :  { %131 = vst.msk [vmem:[#allocation7] sm:$0xff] %vm130_vm1, %v129_v19 }
 0x101   :  { %234 = shalt.err (!%p231_p0)
}
 0x102   :  { %141 = dma.vmem_to_hbm [thread:$0]  %s139_s25, 128, %s291_s3, [#allocation4]  }
 0x103   :  { %247 = dma.done.wait [#allocation4], 128  }
 0x104   :  { %248 = vsyncadd [#allocation4], 4294967168 }
 0x105   :  { %145 = vsyncpa [#allocation3], 1 }
 0x106   :  { %146 = vsyncpa [#allocation6], 1 }
 0x107   :  { %147 = vsyncpa [#allocation4], 1 }

</bundles_post_ra>
